<compile_context>
chip_gen: v7x
topology: tpu7x:2x2x1
jax: 0.10.0
libtpu: 0.0.40
codegen_flags: <defaults>
</compile_context>

<pallas_src>
import math

import jax
import jax.numpy as jnp
from jax.experimental import pallas as pl
from jax.experimental.pallas import tpu as pltpu

# ----- small shapes consistent with the module -----
BATCH = 2
SEQ_LEN = 8
N_UNITS = 32
N_HEADS = 4
D_K = N_UNITS // N_HEADS
PACK = 128  # lane-dense width for the fused QKV projection (3*N_UNITS = 96, padded to 128)


def mha_kernel(x_ref, maskbias_ref, wqkv_ref, bqkv_ref, wo_ref, bo_ref,
               out_ref, ctx_ref):
    """Whole batch fused MHA in one kernel step. All operands resident in VMEM.

    x_ref        : (B*S, 128)  [q | k | v | zero-pad] activations
    maskbias_ref : (B, S, S)   additive mask bias (0 attend, -1e10 masked)
    wqkv_ref     : (128, 128)  block-diag [Wq^T, Wk^T, Wv^T] (zero-padded)
    bqkv_ref     : (1, 128)    [bq | bk | bv | 0]
    wo_ref       : (U, U)      Wo^T (in, out)
    bo_ref       : (1, U)
    out_ref      : (B*S, U)
    ctx_ref      : (B*S, U)    VMEM scratch for concatenated head contexts
    """
    # Single lane-dense fused projection: (B*S, 128) @ (128, 128) + bias.
    qkv = jnp.dot(x_ref[...], wqkv_ref[...],
                  preferred_element_type=jnp.float32) + bqkv_ref[...]
    Q = qkv[:, 0:N_UNITS]                 # (B*S, U)
    K = qkv[:, N_UNITS:2 * N_UNITS]       # (B*S, U)
    V = qkv[:, 2 * N_UNITS:3 * N_UNITS]   # (B*S, U)

    scale = jnp.float32(1.0 / math.sqrt(D_K))

    for b in range(BATCH):                # static unroll over batch (per-batch mask)
        r0 = b * SEQ_LEN
        Qb = Q[r0:r0 + SEQ_LEN, :]
        Kb = K[r0:r0 + SEQ_LEN, :]
        Vb = V[r0:r0 + SEQ_LEN, :]
        mb = maskbias_ref[b]              # (S, S) additive bias, shared by all heads
        for h in range(N_HEADS):          # static unroll over heads
            c0 = h * D_K
            Qh = Qb[:, c0:c0 + D_K]       # (S, Dk)
            Kh = Kb[:, c0:c0 + D_K]       # (S, Dk)
            Vh = Vb[:, c0:c0 + D_K]       # (S, Dk)
            # scores = Qh @ Kh^T / sqrt(d_k) + mask_bias (contract last dims, no transpose)
            s = jax.lax.dot_general(Qh, Kh, (((1,), (1,)), ((), ())),
                                    preferred_element_type=jnp.float32) * scale + mb
            # numerically stable softmax over the key axis; reciprocal -> EUP slot
            s = s - jnp.max(s, axis=-1, keepdims=True)
            e = jnp.exp(s)
            inv = pl.reciprocal(jnp.sum(e, axis=-1, keepdims=True), approx=False)
            p = e * inv
            # write this head's context into its static lane slice of the scratch
            ctx_ref[r0:r0 + SEQ_LEN, c0:c0 + D_K] = jnp.dot(
                p, Vh, preferred_element_type=jnp.float32)

    # TODO(synk): dropout(p=0.1) treated as identity (deterministic forward).
    out = jnp.dot(ctx_ref[...], wo_ref[...],
                  preferred_element_type=jnp.float32) + bo_ref[...]
    out_ref[...] = out.astype(out_ref.dtype)


def mha_forward(query, key, value, mask, params):
    """query/key/value: (B,S,U) f32, mask: (B,S,S) (nonzero = attend) -> (B,S,U) f32."""
    wq, bq, wk, bk, wv, bv, wo, bo = params
    B, S, U = query.shape

    # --- one-time host-side layout prep ---
    # Fused activations: [q | k | v | 0] -> (B*S, 128), full-lane loads in kernel.
    x = jnp.concatenate([query.reshape(B * S, U),
                         key.reshape(B * S, U),
                         value.reshape(B * S, U)], axis=-1)
    x = jnp.pad(x, ((0, 0), (0, PACK - 3 * U)))

    # Block-diagonal fused QKV weight in (in, out) layout + fused bias row.
    w_qkv = jnp.zeros((PACK, PACK), jnp.float32)
    w_qkv = w_qkv.at[0:U, 0:U].set(wq.T)
    w_qkv = w_qkv.at[U:2 * U, U:2 * U].set(wk.T)
    w_qkv = w_qkv.at[2 * U:3 * U, 2 * U:3 * U].set(wv.T)
    b_qkv = jnp.zeros((1, PACK), jnp.float32)
    b_qkv = b_qkv.at[0, 0:3 * U].set(jnp.concatenate([bq, bk, bv]))

    woT = wo.T                    # (in, out) layout for plain x @ W
    bo2 = bo.reshape(1, U)

    # Additive mask bias (matches masked_fill(mask == 0, -1e10) after float32 cast).
    mask_bias = jnp.where(mask.astype(jnp.float32) == 0.0,
                          jnp.float32(-1e10), jnp.float32(0.0))

    vmem = pl.BlockSpec(memory_space=pltpu.MemorySpace.VMEM)

    out_flat = pl.pallas_call(
        mha_kernel,
        out_shape=jax.ShapeDtypeStruct((B * S, U), jnp.float32),
        in_specs=[vmem] * 6,
        out_specs=vmem,
        scratch_shapes=[pltpu.VMEM((B * S, U), jnp.float32)],
    )(x, mask_bias, w_qkv, b_qkv, woT, bo2)

    return out_flat.reshape(B, S, U)


def mha_ref(query, key, value, mask, params):
    """Pure-JAX reference matching the PyTorch forward() semantics (dropout=identity)."""
    wq, bq, wk, bk, wv, bv, wo, bo = params
    B, S, U = query.shape
    Q = (query @ wq.T + bq).reshape(B, S, N_HEADS, D_K).transpose(0, 2, 1, 3)
    K = (key @ wk.T + bk).reshape(B, S, N_HEADS, D_K).transpose(0, 2, 1, 3)
    V = (value @ wv.T + bv).reshape(B, S, N_HEADS, D_K).transpose(0, 2, 1, 3)
    z = jnp.einsum('bhqd,bhkd->bhqk', Q, K) / math.sqrt(D_K)
    m = mask.astype(jnp.float32)[:, None, :, :]
    z = jnp.where(m == 0.0, jnp.float32(-1e10), z)
    p = jax.nn.softmax(z, axis=-1)
    ctx = jnp.einsum('bhqk,bhkd->bhqd', p, V)
    ctx = ctx.transpose(0, 2, 1, 3).reshape(B, S, U)
    return ctx @ wo.T + bo


def init_params(key):
    """Matches init_weights_uniform(): all weights/biases ~ U(-k, k), k = sqrt(1/n_units)."""
    kk = math.sqrt(1.0 / N_UNITS)
    keys = jax.random.split(key, 8)
    u = lambda kkey, shape: jax.random.uniform(kkey, shape, jnp.float32, -kk, kk)
    wq, bq = u(keys[0], (N_UNITS, N_UNITS)), u(keys[1], (N_UNITS,))
    wk, bk = u(keys[2], (N_UNITS, N_UNITS)), u(keys[3], (N_UNITS,))
    wv, bv = u(keys[4], (N_UNITS, N_UNITS)), u(keys[5], (N_UNITS,))
    wo, bo = u(keys[6], (N_UNITS, N_UNITS)), u(keys[7], (N_UNITS,))
    return wq, bq, wk, bk, wv, bv, wo, bo


if __name__ == "__main__":
    root = jax.random.PRNGKey(0)
    pkey, qkey, kkey, vkey = jax.random.split(root, 4)
    params = init_params(pkey)

    query = jax.random.normal(qkey, (BATCH, SEQ_LEN, N_UNITS), jnp.float32)
    key_in = jax.random.normal(kkey, (BATCH, SEQ_LEN, N_UNITS), jnp.float32)
    value = jax.random.normal(vkey, (BATCH, SEQ_LEN, N_UNITS), jnp.float32)
    # Causal mask per batch element: 1 = attend, 0 = masked (forward casts to float32).
    mask = jnp.broadcast_to(jnp.tril(jnp.ones((SEQ_LEN, SEQ_LEN), jnp.float32)),
                            (BATCH, SEQ_LEN, SEQ_LEN))

    out = mha_forward(query, key_in, value, mask, params)
    jax.block_until_ready(out)

    ref = mha_ref(query, key_in, value, mask, params)
    assert out.shape == (BATCH, SEQ_LEN, N_UNITS)
    assert jnp.allclose(out, ref, atol=1e-5, rtol=1e-5)

    print("KERNEL_OK")
</pallas_src>

<mosaic_0001>
module attributes {stable_mosaic.version = 11 : i64} {
  func.func @mha_kernel(%arg0: memref<16x128xf32, #tpu.memory_space<vmem>>, %arg1: memref<2x8x8xf32, #tpu.memory_space<vmem>>, %arg2: memref<128x128xf32, #tpu.memory_space<vmem>>, %arg3: memref<1x128xf32, #tpu.memory_space<vmem>>, %arg4: memref<32x32xf32, #tpu.memory_space<vmem>>, %arg5: memref<1x32xf32, #tpu.memory_space<vmem>>, %arg6: memref<16x32xf32, #tpu.memory_space<vmem>>, %arg7: memref<16x32xf32, #tpu.memory_space<vmem>>) attributes {dimension_semantics = [], scalar_prefetch = 0 : i64, scratch_operands = 1 : i64, tpu.core_type = #tpu.core_type<tc>} {
    %c0 = arith.constant 0 : index
    %c0_0 = arith.constant 0 : index
    %0 = vector.load %arg0[%c0, %c0_0] : memref<16x128xf32, #tpu.memory_space<vmem>>, vector<16x128xf32>
    %c0_1 = arith.constant 0 : index
    %c0_2 = arith.constant 0 : index
    %1 = vector.load %arg2[%c0_1, %c0_2] : memref<128x128xf32, #tpu.memory_space<vmem>>, vector<128x128xf32>
    %cst = arith.constant dense<0.000000e+00> : vector<16x128xf32>
    %2 = tpu.matmul %0, %1, %cst {dimension_numbers = #tpu.dot_dimension_numbers<[1], [0], [0], [1], [0, 0, 1, 1], [], []>} : vector<16x128xf32>, vector<128x128xf32>, vector<16x128xf32> -> vector<16x128xf32>
    %c0_3 = arith.constant 0 : index
    %c0_4 = arith.constant 0 : index
    %3 = vector.load %arg3[%c0_3, %c0_4] : memref<1x128xf32, #tpu.memory_space<vmem>>, vector<1x128xf32>
    %4 = vector.broadcast %3 : vector<1x128xf32> to vector<16x128xf32>
    %5 = arith.addf %2, %4 : vector<16x128xf32>
    %6 = vector.extract_strided_slice %5 {offsets = [0, 0], sizes = [16, 32], strides = [1, 1]} : vector<16x128xf32> to vector<16x32xf32>
    %7 = vector.extract_strided_slice %5 {offsets = [0, 32], sizes = [16, 32], strides = [1, 1]} : vector<16x128xf32> to vector<16x32xf32>
    %8 = vector.extract_strided_slice %5 {offsets = [0, 64], sizes = [16, 32], strides = [1, 1]} : vector<16x128xf32> to vector<16x32xf32>
    %9 = vector.extract_strided_slice %6 {offsets = [0, 0], sizes = [8, 32], strides = [1, 1]} : vector<16x32xf32> to vector<8x32xf32>
    %10 = vector.extract_strided_slice %7 {offsets = [0, 0], sizes = [8, 32], strides = [1, 1]} : vector<16x32xf32> to vector<8x32xf32>
    %11 = vector.extract_strided_slice %8 {offsets = [0, 0], sizes = [8, 32], strides = [1, 1]} : vector<16x32xf32> to vector<8x32xf32>
    %c0_5 = arith.constant 0 : index
    %c0_6 = arith.constant 0 : index
    %c0_7 = arith.constant 0 : index
    %12 = vector.load %arg1[%c0_5, %c0_6, %c0_7] : memref<2x8x8xf32, #tpu.memory_space<vmem>>, vector<1x8x8xf32>
    %13 = vector.shape_cast %12 : vector<1x8x8xf32> to vector<8x8xf32>
    %14 = vector.extract_strided_slice %9 {offsets = [0, 0], sizes = [8, 8], strides = [1, 1]} : vector<8x32xf32> to vector<8x8xf32>
    %15 = vector.extract_strided_slice %10 {offsets = [0, 0], sizes = [8, 8], strides = [1, 1]} : vector<8x32xf32> to vector<8x8xf32>
    %16 = vector.extract_strided_slice %11 {offsets = [0, 0], sizes = [8, 8], strides = [1, 1]} : vector<8x32xf32> to vector<8x8xf32>
    %cst_8 = arith.constant dense<0.000000e+00> : vector<8x8xf32>
    %17 = tpu.matmul %14, %15, %cst_8 {dimension_numbers = #tpu.dot_dimension_numbers<[1], [1], [0], [0], [0, 0, 1, 0], [], []>} : vector<8x8xf32>, vector<8x8xf32>, vector<8x8xf32> -> vector<8x8xf32>
    %cst_9 = arith.constant 0.353553385 : f32
    %18 = vector.broadcast %cst_9 : f32 to vector<8x8xf32>
    %19 = arith.mulf %17, %18 : vector<8x8xf32>
    %20 = arith.addf %19, %13 : vector<8x8xf32>
    %cst_10 = arith.constant dense<0xFF800000> : vector<8xf32>
    %21 = vector.multi_reduction <maximumf>, %20, %cst_10 [1] : vector<8x8xf32> to vector<8xf32>
    %22 = vector.shape_cast %21 : vector<8xf32> to vector<8x1xf32>
    %23 = vector.broadcast %22 : vector<8x1xf32> to vector<8x8xf32>
    %24 = arith.subf %20, %23 : vector<8x8xf32>
    %25 = math.exp %24 : vector<8x8xf32>
    %cst_11 = arith.constant dense<0.000000e+00> : vector<8xf32>
    %26 = vector.multi_reduction <add>, %25, %cst_11 [1] : vector<8x8xf32> to vector<8xf32>
    %27 = vector.shape_cast %26 : vector<8xf32> to vector<8x1xf32>
    %28 = tpu.reciprocal %27 : vector<8x1xf32> -> vector<8x1xf32>
    %29 = vector.broadcast %28 : vector<8x1xf32> to vector<8x8xf32>
    %30 = arith.mulf %25, %29 : vector<8x8xf32>
    %cst_12 = arith.constant dense<0.000000e+00> : vector<8x8xf32>
    %31 = tpu.matmul %30, %16, %cst_12 {dimension_numbers = #tpu.dot_dimension_numbers<[1], [0], [0], [1], [0, 0, 1, 1], [], []>} : vector<8x8xf32>, vector<8x8xf32>, vector<8x8xf32> -> vector<8x8xf32>
    %c0_13 = arith.constant 0 : index
    %c0_14 = arith.constant 0 : index
    %32 = vector.load %arg7[%c0_13, %c0_14] : memref<16x32xf32, #tpu.memory_space<vmem>>, vector<8x8xf32>
    tpu.vector_store %arg7[%c0_13, %c0_14], %31 {strides = array<i32>} : memref<16x32xf32, #tpu.memory_space<vmem>>, vector<8x8xf32>,
    %33 = vector.extract_strided_slice %9 {offsets = [0, 8], sizes = [8, 8], strides = [1, 1]} : vector<8x32xf32> to vector<8x8xf32>
    %34 = vector.extract_strided_slice %10 {offsets = [0, 8], sizes = [8, 8], strides = [1, 1]} : vector<8x32xf32> to vector<8x8xf32>
    %35 = vector.extract_strided_slice %11 {offsets = [0, 8], sizes = [8, 8], strides = [1, 1]} : vector<8x32xf32> to vector<8x8xf32>
    %cst_15 = arith.constant dense<0.000000e+00> : vector<8x8xf32>
    %36 = tpu.matmul %33, %34, %cst_15 {dimension_numbers = #tpu.dot_dimension_numbers<[1], [1], [0], [0], [0, 0, 1, 0], [], []>} : vector<8x8xf32>, vector<8x8xf32>, vector<8x8xf32> -> vector<8x8xf32>
    %cst_16 = arith.constant 0.353553385 : f32
    %37 = vector.broadcast %cst_16 : f32 to vector<8x8xf32>
    %38 = arith.mulf %36, %37 : vector<8x8xf32>
    %39 = arith.addf %38, %13 : vector<8x8xf32>
    %cst_17 = arith.constant dense<0xFF800000> : vector<8xf32>
    %40 = vector.multi_reduction <maximumf>, %39, %cst_17 [1] : vector<8x8xf32> to vector<8xf32>
    %41 = vector.shape_cast %40 : vector<8xf32> to vector<8x1xf32>
    %42 = vector.broadcast %41 : vector<8x1xf32> to vector<8x8xf32>
    %43 = arith.subf %39, %42 : vector<8x8xf32>
    %44 = math.exp %43 : vector<8x8xf32>
    %cst_18 = arith.constant dense<0.000000e+00> : vector<8xf32>
    %45 = vector.multi_reduction <add>, %44, %cst_18 [1] : vector<8x8xf32> to vector<8xf32>
    %46 = vector.shape_cast %45 : vector<8xf32> to vector<8x1xf32>
    %47 = tpu.reciprocal %46 : vector<8x1xf32> -> vector<8x1xf32>
    %48 = vector.broadcast %47 : vector<8x1xf32> to vector<8x8xf32>
    %49 = arith.mulf %44, %48 : vector<8x8xf32>
    %cst_19 = arith.constant dense<0.000000e+00> : vector<8x8xf32>
    %50 = tpu.matmul %49, %35, %cst_19 {dimension_numbers = #tpu.dot_dimension_numbers<[1], [0], [0], [1], [0, 0, 1, 1], [], []>} : vector<8x8xf32>, vector<8x8xf32>, vector<8x8xf32> -> vector<8x8xf32>
    %c0_20 = arith.constant 0 : index
    %c8 = arith.constant 8 : index
    %51 = vector.load %arg7[%c0_20, %c8] : memref<16x32xf32, #tpu.memory_space<vmem>>, vector<8x8xf32>
    tpu.vector_store %arg7[%c0_20, %c8], %50 {strides = array<i32>} : memref<16x32xf32, #tpu.memory_space<vmem>>, vector<8x8xf32>,
    %52 = vector.extract_strided_slice %9 {offsets = [0, 16], sizes = [8, 8], strides = [1, 1]} : vector<8x32xf32> to vector<8x8xf32>
    %53 = vector.extract_strided_slice %10 {offsets = [0, 16], sizes = [8, 8], strides = [1, 1]} : vector<8x32xf32> to vector<8x8xf32>
    %54 = vector.extract_strided_slice %11 {offsets = [0, 16], sizes = [8, 8], strides = [1, 1]} : vector<8x32xf32> to vector<8x8xf32>
    %cst_21 = arith.constant dense<0.000000e+00> : vector<8x8xf32>
    %55 = tpu.matmul %52, %53, %cst_21 {dimension_numbers = #tpu.dot_dimension_numbers<[1], [1], [0], [0], [0, 0, 1, 0], [], []>} : vector<8x8xf32>, vector<8x8xf32>, vector<8x8xf32> -> vector<8x8xf32>
    %cst_22 = arith.constant 0.353553385 : f32
    %56 = vector.broadcast %cst_22 : f32 to vector<8x8xf32>
    %57 = arith.mulf %55, %56 : vector<8x8xf32>
    %58 = arith.addf %57, %13 : vector<8x8xf32>
    %cst_23 = arith.constant dense<0xFF800000> : vector<8xf32>
    %59 = vector.multi_reduction <maximumf>, %58, %cst_23 [1] : vector<8x8xf32> to vector<8xf32>
    %60 = vector.shape_cast %59 : vector<8xf32> to vector<8x1xf32>
    %61 = vector.broadcast %60 : vector<8x1xf32> to vector<8x8xf32>
    %62 = arith.subf %58, %61 : vector<8x8xf32>
    %63 = math.exp %62 : vector<8x8xf32>
    %cst_24 = arith.constant dense<0.000000e+00> : vector<8xf32>
    %64 = vector.multi_reduction <add>, %63, %cst_24 [1] : vector<8x8xf32> to vector<8xf32>
    %65 = vector.shape_cast %64 : vector<8xf32> to vector<8x1xf32>
    %66 = tpu.reciprocal %65 : vector<8x1xf32> -> vector<8x1xf32>
    %67 = vector.broadcast %66 : vector<8x1xf32> to vector<8x8xf32>
    %68 = arith.mulf %63, %67 : vector<8x8xf32>
    %cst_25 = arith.constant dense<0.000000e+00> : vector<8x8xf32>
    %69 = tpu.matmul %68, %54, %cst_25 {dimension_numbers = #tpu.dot_dimension_numbers<[1], [0], [0], [1], [0, 0, 1, 1], [], []>} : vector<8x8xf32>, vector<8x8xf32>, vector<8x8xf32> -> vector<8x8xf32>
    %c0_26 = arith.constant 0 : index
    %c16 = arith.constant 16 : index
    %70 = vector.load %arg7[%c0_26, %c16] : memref<16x32xf32, #tpu.memory_space<vmem>>, vector<8x8xf32>
    tpu.vector_store %arg7[%c0_26, %c16], %69 {strides = array<i32>} : memref<16x32xf32, #tpu.memory_space<vmem>>, vector<8x8xf32>,
    %71 = vector.extract_strided_slice %9 {offsets = [0, 24], sizes = [8, 8], strides = [1, 1]} : vector<8x32xf32> to vector<8x8xf32>
    %72 = vector.extract_strided_slice %10 {offsets = [0, 24], sizes = [8, 8], strides = [1, 1]} : vector<8x32xf32> to vector<8x8xf32>
    %73 = vector.extract_strided_slice %11 {offsets = [0, 24], sizes = [8, 8], strides = [1, 1]} : vector<8x32xf32> to vector<8x8xf32>
    %cst_27 = arith.constant dense<0.000000e+00> : vector<8x8xf32>
    %74 = tpu.matmul %71, %72, %cst_27 {dimension_numbers = #tpu.dot_dimension_numbers<[1], [1], [0], [0], [0, 0, 1, 0], [], []>} : vector<8x8xf32>, vector<8x8xf32>, vector<8x8xf32> -> vector<8x8xf32>
    %cst_28 = arith.constant 0.353553385 : f32
    %75 = vector.broadcast %cst_28 : f32 to vector<8x8xf32>
    %76 = arith.mulf %74, %75 : vector<8x8xf32>
    %77 = arith.addf %76, %13 : vector<8x8xf32>
    %cst_29 = arith.constant dense<0xFF800000> : vector<8xf32>
    %78 = vector.multi_reduction <maximumf>, %77, %cst_29 [1] : vector<8x8xf32> to vector<8xf32>
    %79 = vector.shape_cast %78 : vector<8xf32> to vector<8x1xf32>
    %80 = vector.broadcast %79 : vector<8x1xf32> to vector<8x8xf32>
    %81 = arith.subf %77, %80 : vector<8x8xf32>
    %82 = math.exp %81 : vector<8x8xf32>
    %cst_30 = arith.constant dense<0.000000e+00> : vector<8xf32>
    %83 = vector.multi_reduction <add>, %82, %cst_30 [1] : vector<8x8xf32> to vector<8xf32>
    %84 = vector.shape_cast %83 : vector<8xf32> to vector<8x1xf32>
    %85 = tpu.reciprocal %84 : vector<8x1xf32> -> vector<8x1xf32>
    %86 = vector.broadcast %85 : vector<8x1xf32> to vector<8x8xf32>
    %87 = arith.mulf %82, %86 : vector<8x8xf32>
    %cst_31 = arith.constant dense<0.000000e+00> : vector<8x8xf32>
    %88 = tpu.matmul %87, %73, %cst_31 {dimension_numbers = #tpu.dot_dimension_numbers<[1], [0], [0], [1], [0, 0, 1, 1], [], []>} : vector<8x8xf32>, vector<8x8xf32>, vector<8x8xf32> -> vector<8x8xf32>
    %c0_32 = arith.constant 0 : index
    %c24 = arith.constant 24 : index
    %89 = vector.load %arg7[%c0_32, %c24] : memref<16x32xf32, #tpu.memory_space<vmem>>, vector<8x8xf32>
    tpu.vector_store %arg7[%c0_32, %c24], %88 {strides = array<i32>} : memref<16x32xf32, #tpu.memory_space<vmem>>, vector<8x8xf32>,
    %90 = vector.extract_strided_slice %6 {offsets = [8, 0], sizes = [8, 32], strides = [1, 1]} : vector<16x32xf32> to vector<8x32xf32>
    %91 = vector.extract_strided_slice %7 {offsets = [8, 0], sizes = [8, 32], strides = [1, 1]} : vector<16x32xf32> to vector<8x32xf32>
    %92 = vector.extract_strided_slice %8 {offsets = [8, 0], sizes = [8, 32], strides = [1, 1]} : vector<16x32xf32> to vector<8x32xf32>
    %c1 = arith.constant 1 : index
    %c0_33 = arith.constant 0 : index
    %c0_34 = arith.constant 0 : index
    %93 = vector.load %arg1[%c1, %c0_33, %c0_34] : memref<2x8x8xf32, #tpu.memory_space<vmem>>, vector<1x8x8xf32>
    %94 = vector.shape_cast %93 : vector<1x8x8xf32> to vector<8x8xf32>
    %95 = vector.extract_strided_slice %90 {offsets = [0, 0], sizes = [8, 8], strides = [1, 1]} : vector<8x32xf32> to vector<8x8xf32>
    %96 = vector.extract_strided_slice %91 {offsets = [0, 0], sizes = [8, 8], strides = [1, 1]} : vector<8x32xf32> to vector<8x8xf32>
    %97 = vector.extract_strided_slice %92 {offsets = [0, 0], sizes = [8, 8], strides = [1, 1]} : vector<8x32xf32> to vector<8x8xf32>
    %cst_35 = arith.constant dense<0.000000e+00> : vector<8x8xf32>
    %98 = tpu.matmul %95, %96, %cst_35 {dimension_numbers = #tpu.dot_dimension_numbers<[1], [1], [0], [0], [0, 0, 1, 0], [], []>} : vector<8x8xf32>, vector<8x8xf32>, vector<8x8xf32> -> vector<8x8xf32>
    %cst_36 = arith.constant 0.353553385 : f32
    %99 = vector.broadcast %cst_36 : f32 to vector<8x8xf32>
    %100 = arith.mulf %98, %99 : vector<8x8xf32>
    %101 = arith.addf %100, %94 : vector<8x8xf32>
    %cst_37 = arith.constant dense<0xFF800000> : vector<8xf32>
    %102 = vector.multi_reduction <maximumf>, %101, %cst_37 [1] : vector<8x8xf32> to vector<8xf32>
    %103 = vector.shape_cast %102 : vector<8xf32> to vector<8x1xf32>
    %104 = vector.broadcast %103 : vector<8x1xf32> to vector<8x8xf32>
    %105 = arith.subf %101, %104 : vector<8x8xf32>
    %106 = math.exp %105 : vector<8x8xf32>
    %cst_38 = arith.constant dense<0.000000e+00> : vector<8xf32>
    %107 = vector.multi_reduction <add>, %106, %cst_38 [1] : vector<8x8xf32> to vector<8xf32>
    %108 = vector.shape_cast %107 : vector<8xf32> to vector<8x1xf32>
    %109 = tpu.reciprocal %108 : vector<8x1xf32> -> vector<8x1xf32>
    %110 = vector.broadcast %109 : vector<8x1xf32> to vector<8x8xf32>
    %111 = arith.mulf %106, %110 : vector<8x8xf32>
    %cst_39 = arith.constant dense<0.000000e+00> : vector<8x8xf32>
    %112 = tpu.matmul %111, %97, %cst_39 {dimension_numbers = #tpu.dot_dimension_numbers<[1], [0], [0], [1], [0, 0, 1, 1], [], []>} : vector<8x8xf32>, vector<8x8xf32>, vector<8x8xf32> -> vector<8x8xf32>
    %c8_40 = arith.constant 8 : index
    %c0_41 = arith.constant 0 : index
    %113 = vector.load %arg7[%c8_40, %c0_41] : memref<16x32xf32, #tpu.memory_space<vmem>>, vector<8x8xf32>
    tpu.vector_store %arg7[%c8_40, %c0_41], %112 {strides = array<i32>} : memref<16x32xf32, #tpu.memory_space<vmem>>, vector<8x8xf32>,
    %114 = vector.extract_strided_slice %90 {offsets = [0, 8], sizes = [8, 8], strides = [1, 1]} : vector<8x32xf32> to vector<8x8xf32>
    %115 = vector.extract_strided_slice %91 {offsets = [0, 8], sizes = [8, 8], strides = [1, 1]} : vector<8x32xf32> to vector<8x8xf32>
    %116 = vector.extract_strided_slice %92 {offsets = [0, 8], sizes = [8, 8], strides = [1, 1]} : vector<8x32xf32> to vector<8x8xf32>
    %cst_42 = arith.constant dense<0.000000e+00> : vector<8x8xf32>
    %117 = tpu.matmul %114, %115, %cst_42 {dimension_numbers = #tpu.dot_dimension_numbers<[1], [1], [0], [0], [0, 0, 1, 0], [], []>} : vector<8x8xf32>, vector<8x8xf32>, vector<8x8xf32> -> vector<8x8xf32>
    %cst_43 = arith.constant 0.353553385 : f32
    %118 = vector.broadcast %cst_43 : f32 to vector<8x8xf32>
    %119 = arith.mulf %117, %118 : vector<8x8xf32>
    %120 = arith.addf %119, %94 : vector<8x8xf32>
    %cst_44 = arith.constant dense<0xFF800000> : vector<8xf32>
    %121 = vector.multi_reduction <maximumf>, %120, %cst_44 [1] : vector<8x8xf32> to vector<8xf32>
    %122 = vector.shape_cast %121 : vector<8xf32> to vector<8x1xf32>
    %123 = vector.broadcast %122 : vector<8x1xf32> to vector<8x8xf32>
    %124 = arith.subf %120, %123 : vector<8x8xf32>
    %125 = math.exp %124 : vector<8x8xf32>
    %cst_45 = arith.constant dense<0.000000e+00> : vector<8xf32>
    %126 = vector.multi_reduction <add>, %125, %cst_45 [1] : vector<8x8xf32> to vector<8xf32>
    %127 = vector.shape_cast %126 : vector<8xf32> to vector<8x1xf32>
    %128 = tpu.reciprocal %127 : vector<8x1xf32> -> vector<8x1xf32>
    %129 = vector.broadcast %128 : vector<8x1xf32> to vector<8x8xf32>
    %130 = arith.mulf %125, %129 : vector<8x8xf32>
    %cst_46 = arith.constant dense<0.000000e+00> : vector<8x8xf32>
    %131 = tpu.matmul %130, %116, %cst_46 {dimension_numbers = #tpu.dot_dimension_numbers<[1], [0], [0], [1], [0, 0, 1, 1], [], []>} : vector<8x8xf32>, vector<8x8xf32>, vector<8x8xf32> -> vector<8x8xf32>
    %c8_47 = arith.constant 8 : index
    %c8_48 = arith.constant 8 : index
    %132 = vector.load %arg7[%c8_47, %c8_48] : memref<16x32xf32, #tpu.memory_space<vmem>>, vector<8x8xf32>
    tpu.vector_store %arg7[%c8_47, %c8_48], %131 {strides = array<i32>} : memref<16x32xf32, #tpu.memory_space<vmem>>, vector<8x8xf32>,
    %133 = vector.extract_strided_slice %90 {offsets = [0, 16], sizes = [8, 8], strides = [1, 1]} : vector<8x32xf32> to vector<8x8xf32>
    %134 = vector.extract_strided_slice %91 {offsets = [0, 16], sizes = [8, 8], strides = [1, 1]} : vector<8x32xf32> to vector<8x8xf32>
    %135 = vector.extract_strided_slice %92 {offsets = [0, 16], sizes = [8, 8], strides = [1, 1]} : vector<8x32xf32> to vector<8x8xf32>
    %cst_49 = arith.constant dense<0.000000e+00> : vector<8x8xf32>
    %136 = tpu.matmul %133, %134, %cst_49 {dimension_numbers = #tpu.dot_dimension_numbers<[1], [1], [0], [0], [0, 0, 1, 0], [], []>} : vector<8x8xf32>, vector<8x8xf32>, vector<8x8xf32> -> vector<8x8xf32>
    %cst_50 = arith.constant 0.353553385 : f32
    %137 = vector.broadcast %cst_50 : f32 to vector<8x8xf32>
    %138 = arith.mulf %136, %137 : vector<8x8xf32>
    %139 = arith.addf %138, %94 : vector<8x8xf32>
    %cst_51 = arith.constant dense<0xFF800000> : vector<8xf32>
    %140 = vector.multi_reduction <maximumf>, %139, %cst_51 [1] : vector<8x8xf32> to vector<8xf32>
    %141 = vector.shape_cast %140 : vector<8xf32> to vector<8x1xf32>
    %142 = vector.broadcast %141 : vector<8x1xf32> to vector<8x8xf32>
    %143 = arith.subf %139, %142 : vector<8x8xf32>
    %144 = math.exp %143 : vector<8x8xf32>
    %cst_52 = arith.constant dense<0.000000e+00> : vector<8xf32>
    %145 = vector.multi_reduction <add>, %144, %cst_52 [1] : vector<8x8xf32> to vector<8xf32>
    %146 = vector.shape_cast %145 : vector<8xf32> to vector<8x1xf32>
    %147 = tpu.reciprocal %146 : vector<8x1xf32> -> vector<8x1xf32>
    %148 = vector.broadcast %147 : vector<8x1xf32> to vector<8x8xf32>
    %149 = arith.mulf %144, %148 : vector<8x8xf32>
    %cst_53 = arith.constant dense<0.000000e+00> : vector<8x8xf32>
    %150 = tpu.matmul %149, %135, %cst_53 {dimension_numbers = #tpu.dot_dimension_numbers<[1], [0], [0], [1], [0, 0, 1, 1], [], []>} : vector<8x8xf32>, vector<8x8xf32>, vector<8x8xf32> -> vector<8x8xf32>
    %c8_54 = arith.constant 8 : index
    %c16_55 = arith.constant 16 : index
    %151 = vector.load %arg7[%c8_54, %c16_55] : memref<16x32xf32, #tpu.memory_space<vmem>>, vector<8x8xf32>
    tpu.vector_store %arg7[%c8_54, %c16_55], %150 {strides = array<i32>} : memref<16x32xf32, #tpu.memory_space<vmem>>, vector<8x8xf32>,
    %152 = vector.extract_strided_slice %90 {offsets = [0, 24], sizes = [8, 8], strides = [1, 1]} : vector<8x32xf32> to vector<8x8xf32>
    %153 = vector.extract_strided_slice %91 {offsets = [0, 24], sizes = [8, 8], strides = [1, 1]} : vector<8x32xf32> to vector<8x8xf32>
    %154 = vector.extract_strided_slice %92 {offsets = [0, 24], sizes = [8, 8], strides = [1, 1]} : vector<8x32xf32> to vector<8x8xf32>
    %cst_56 = arith.constant dense<0.000000e+00> : vector<8x8xf32>
    %155 = tpu.matmul %152, %153, %cst_56 {dimension_numbers = #tpu.dot_dimension_numbers<[1], [1], [0], [0], [0, 0, 1, 0], [], []>} : vector<8x8xf32>, vector<8x8xf32>, vector<8x8xf32> -> vector<8x8xf32>
    %cst_57 = arith.constant 0.353553385 : f32
    %156 = vector.broadcast %cst_57 : f32 to vector<8x8xf32>
    %157 = arith.mulf %155, %156 : vector<8x8xf32>
    %158 = arith.addf %157, %94 : vector<8x8xf32>
    %cst_58 = arith.constant dense<0xFF800000> : vector<8xf32>
    %159 = vector.multi_reduction <maximumf>, %158, %cst_58 [1] : vector<8x8xf32> to vector<8xf32>
    %160 = vector.shape_cast %159 : vector<8xf32> to vector<8x1xf32>
    %161 = vector.broadcast %160 : vector<8x1xf32> to vector<8x8xf32>
    %162 = arith.subf %158, %161 : vector<8x8xf32>
    %163 = math.exp %162 : vector<8x8xf32>
    %cst_59 = arith.constant dense<0.000000e+00> : vector<8xf32>
    %164 = vector.multi_reduction <add>, %163, %cst_59 [1] : vector<8x8xf32> to vector<8xf32>
    %165 = vector.shape_cast %164 : vector<8xf32> to vector<8x1xf32>
    %166 = tpu.reciprocal %165 : vector<8x1xf32> -> vector<8x1xf32>
    %167 = vector.broadcast %166 : vector<8x1xf32> to vector<8x8xf32>
    %168 = arith.mulf %163, %167 : vector<8x8xf32>
    %cst_60 = arith.constant dense<0.000000e+00> : vector<8x8xf32>
    %169 = tpu.matmul %168, %154, %cst_60 {dimension_numbers = #tpu.dot_dimension_numbers<[1], [0], [0], [1], [0, 0, 1, 1], [], []>} : vector<8x8xf32>, vector<8x8xf32>, vector<8x8xf32> -> vector<8x8xf32>
    %c8_61 = arith.constant 8 : index
    %c24_62 = arith.constant 24 : index
    %170 = vector.load %arg7[%c8_61, %c24_62] : memref<16x32xf32, #tpu.memory_space<vmem>>, vector<8x8xf32>
    tpu.vector_store %arg7[%c8_61, %c24_62], %169 {strides = array<i32>} : memref<16x32xf32, #tpu.memory_space<vmem>>, vector<8x8xf32>,
    %c0_63 = arith.constant 0 : index
    %c0_64 = arith.constant 0 : index
    %171 = vector.load %arg7[%c0_63, %c0_64] : memref<16x32xf32, #tpu.memory_space<vmem>>, vector<16x32xf32>
    %c0_65 = arith.constant 0 : index
    %c0_66 = arith.constant 0 : index
    %172 = vector.load %arg4[%c0_65, %c0_66] : memref<32x32xf32, #tpu.memory_space<vmem>>, vector<32x32xf32>
    %cst_67 = arith.constant dense<0.000000e+00> : vector<16x32xf32>
    %173 = tpu.matmul %171, %172, %cst_67 {dimension_numbers = #tpu.dot_dimension_numbers<[1], [0], [0], [1], [0, 0, 1, 1], [], []>} : vector<16x32xf32>, vector<32x32xf32>, vector<16x32xf32> -> vector<16x32xf32>
    %c0_68 = arith.constant 0 : index
    %c0_69 = arith.constant 0 : index
    %174 = vector.load %arg5[%c0_68, %c0_69] : memref<1x32xf32, #tpu.memory_space<vmem>>, vector<1x32xf32>
    %175 = vector.broadcast %174 : vector<1x32xf32> to vector<16x32xf32>
    %176 = arith.addf %173, %175 : vector<16x32xf32>
    %c0_70 = arith.constant 0 : index
    %c0_71 = arith.constant 0 : index
    %177 = vector.load %arg6[%c0_70, %c0_71] : memref<16x32xf32, #tpu.memory_space<vmem>>, vector<16x32xf32>
    tpu.vector_store %arg6[%c0_70, %c0_71], %176 {strides = array<i32>} : memref<16x32xf32, #tpu.memory_space<vmem>>, vector<16x32xf32>,
    return
  }
}

</mosaic_0001>

<bundles_post_ra>
// kernel: tpu_custom_call.1
= control target key start
LH: loop header
LB: loop body
LE: loop exit
PB: predicated region body
PF: predicated region fallthrough
CT: control target
= control target key end

     0   :  { %11 = vsyncpa [#allocation4], 0  ;;  %s2410_s0 = inlined_call_operand.hbm [shape: f32[16,128], index: 0, kind: input, shape index: {}]   ;;  %s2411_s1 = inlined_call_operand.hbm [shape: f32[2,8,8], index: 1, kind: input, shape index: {}]   ;;  %s2412_s2 = inlined_call_operand.hbm [shape: f32[128,128], index: 2, kind: input, shape index: {}]   ;;  %s2413_s3 = inlined_call_operand.vmem [shape: f32[1,128], index: 3, kind: input, shape index: {}]   ;;  %s2414_s4 = inlined_call_operand.hbm [shape: f32[32,32], index: 4, kind: input, shape index: {}]   ;;  %s2415_s5 = inlined_call_operand.vmem [shape: f32[1,32], index: 5, kind: input, shape index: {}]   ;;  %s2416_s6 = inlined_call_operand.hbm [shape: f32[16,32], index: 6, kind: output, shape index: {}]  }
   0x1   :  { %12 = vsyncpa [#allocation7], 0 }
   0x2   :  { %13 = vsyncpa [#allocation10], 0 }
   0x3   :  { %14 = vsyncpa [#allocation5], 0  ;;  %s2090_s21 = smov [#allocation6]   ;;  %s2091_s23 = smov [#allocation3]  }
   0x4   :  { %s32_s22 = sshll.u32 %s2090_s21, 4  ;;  %s20_s24 = sshll.u32 %s2091_s23, 4  ;;  %s33_s22 = int_to_ptr.vmem [resolvable:$true] %s32_s22  ;;  %s2147_s24 = int_to_ptr.vmem [resolvable:$true] %s20_s24 }
   0x5   :  { %s1972_s27 = scalar_lea.hbm %s2411_s1, 256 }
   0x6   :  { %p1973_p0 = scmp.ne.s32.totalorder %s2411_s1, %s1972_s27  ;;  %p1976_p1 = scmp.lt.u32.totalorder %s1972_s27, %s2411_s1 }
   0x8   :  { %p1978_p2 = pnand %p1976_p1, %p1973_p0 }
   0xa   :  { %1981 = shalt.err (!%p1978_p2)
}
   0xb   :  { %s1982_s8 = scalar_lea.vmem %s33_s22, 256  ;;  %p1987_p4 = scmp.lt.s32.totalorder %s33_s22, %s33_s22 }
   0xc   :  { %p1983_p3 = scmp.ne.s32.totalorder %s33_s22, %s1982_s8  ;;  %p1988_p5 = scmp.lt.s32.totalorder %s1982_s8, %s1982_s8 }
   0xe   :  { %p1989_p6 = por %p1988_p5, %p1987_p4 }
  0x10   :  { %p1990_p7 = pnand %p1989_p6, %p1983_p3 }
  0x12   :  { %1993 = shalt.err (!%p1990_p7)
}
  0x13   :  { %s2092_s9 = smov 128   ;;  %s2093_s10 = smov 8  }
  0x14   :  { %38 = dma.hbm_to_vmem [thread:$0]  %s2411_s1, 256, %s33_s22, [#allocation7], %s2092_s9, %s2092_s9, %s2093_s10  }
  0x15   :  { %s1994_s15 = scalar_lea.hbm %s2410_s0, 256 }
  0x16   :  { %p1995_p8 = scmp.ne.s32.totalorder %s2410_s0, %s1994_s15  ;;  %p1998_p9 = scmp.lt.u32.totalorder %s1994_s15, %s2410_s0 }
  0x18   :  { %p2000_p10 = pnand %p1998_p9, %p1995_p8 }
  0x1a   :  { %2003 = shalt.err (!%p2000_p10)
}
  0x1b   :  { %s2004_s20 = scalar_lea.vmem %s2147_s24, 256  ;;  %p2009_p12 = scmp.lt.s32.totalorder %s2147_s24, %s2147_s24 }
  0x1c   :  { %p2005_p11 = scmp.ne.s32.totalorder %s2147_s24, %s2004_s20  ;;  %p2010_p13 = scmp.lt.s32.totalorder %s2004_s20, %s2004_s20 }
  0x1e   :  { %p2011_p0 = por %p2010_p13, %p2009_p12 }
  0x20   :  { %p2012_p1 = pnand %p2011_p0, %p2005_p11 }
  0x22   :  { %2015 = shalt.err (!%p2012_p1)
}
  0x23   :  { %26 = dma.hbm_to_vmem [thread:$0]  %s2410_s0, 256, %s2147_s24, [#allocation4], %s2092_s9, %s2092_s9, %s2093_s10  }
  0x24   :  { %s2094_s22 = smov [#allocation8]   ;;  %s2095_s25 = smov [#allocation9]  }
  0x25   :  { %s44_s23 = sshll.u32 %s2094_s22, 4  ;;  %s58_s26 = sshll.u32 %s2095_s25, 4  ;;  %s45_s23 = int_to_ptr.vmem [resolvable:$true] %s44_s23  ;;  %s2184_s26 = int_to_ptr.vmem [resolvable:$true] %s58_s26 }
  0x26   :  { %s2016_s29 = scalar_lea.hbm %s2412_s2, 2048 }
  0x27   :  { %p2017_p2 = scmp.ne.s32.totalorder %s2412_s2, %s2016_s29  ;;  %p2020_p3 = scmp.lt.u32.totalorder %s2016_s29, %s2412_s2 }
  0x29   :  { %p2022_p4 = pnand %p2020_p3, %p2017_p2 }
  0x2b   :  { %2025 = shalt.err (!%p2022_p4)
}
  0x2c   :  { %s2026_s0 = scalar_lea.vmem %s45_s23, 2048  ;;  %p2031_p6 = scmp.lt.s32.totalorder %s45_s23, %s45_s23 }
  0x2d   :  { %p2027_p5 = scmp.ne.s32.totalorder %s45_s23, %s2026_s0  ;;  %p2032_p7 = scmp.lt.s32.totalorder %s2026_s0, %s2026_s0 }
  0x2f   :  { %p2033_p8 = por %p2032_p7, %p2031_p6 }
  0x31   :  { %p2034_p9 = pnand %p2033_p8, %p2027_p5 }
  0x33   :  { %2037 = shalt.err (!%p2034_p9)
}
  0x34   :  { %50 = dma.hbm_to_vmem [thread:$0]  %s2412_s2, 2048, %s45_s23, [#allocation7], %s2092_s9, %s2092_s9, %s2093_s10  }
  0x35   :  { %s2038_s15 = scalar_lea.hbm %s2414_s4, 512 }
  0x36   :  { %p2039_p10 = scmp.ne.s32.totalorder %s2414_s4, %s2038_s15  ;;  %p2042_p11 = scmp.lt.u32.totalorder %s2038_s15, %s2414_s4 }
  0x38   :  { %p2044_p12 = pnand %p2042_p11, %p2039_p10 }
  0x3a   :  { %2047 = shalt.err (!%p2044_p12)
}
  0x3b   :  { %s2048_s20 = scalar_lea.vmem %s2184_s26, 512  ;;  %p2053_p0 = scmp.lt.s32.totalorder %s2184_s26, %s2184_s26 }
  0x3c   :  { %p2049_p13 = scmp.ne.s32.totalorder %s2184_s26, %s2048_s20  ;;  %p2054_p1 = scmp.lt.s32.totalorder %s2048_s20, %s2048_s20 }
  0x3e   :  { %p2055_p2 = por %p2054_p1, %p2053_p0 }
  0x40   :  { %p2056_p3 = pnand %p2055_p2, %p2049_p13 }
  0x42   :  { %2059 = shalt.err (!%p2056_p3)
}
  0x43   :  { %64 = dma.hbm_to_vmem [thread:$0]  %s2414_s4, 512, %s2184_s26, [#allocation10], %s2092_s9, %s2092_s9, %s2093_s10  }
  0x44   :  { %2082 = dma.done.wait [#allocation4], 256  }
  0x45   :  { %2083 = vsyncadd [#allocation4], 4294967040 }
  0x46   :  { %2084 = dma.done.wait [#allocation7], 2304  }
  0x47   :  { %2085 = vsyncadd [#allocation7], 4294964992 }
  0x48   :  { %2086 = dma.done.wait [#allocation10], 512  }
  0x49   :  { %2087 = vsyncadd [#allocation10], 4294966784  ;;  %v81_v0 = vld [vmem:[#allocation8] sm:$0xff]  ;;  %v82_v1 = vld [vmem:[#allocation8 + $0x8] sm:$0xff]  ;;  %v2096_v26 = vmov 0.0   ;;  %vm2097_vm0 = vmmov 0  }
  0x4a   :  { %v83_v2 = vld [vmem:[#allocation8 + $0x10] sm:$0xff]  ;;  %v1878_v3 = vpack.c.bf16 %v82_v1, %v81_v0  ;;  %v84_v4 = vld [vmem:[#allocation8 + $0x18] sm:$0xff]  ;;  %v85_v6 = vld [vmem:[#allocation8 + $0x20] sm:$0xff]  ;;  %1787 = vmatprep.subr.mxu1 %v2096_v26  ;;  %1789 = vmatprep.mubr.msk.f32.mxu1 %vm2097_vm0, %v2096_v26  ;;  %s2098_s22 = smov 64   ;;  %s2099_s23 = smov 96   ;;  %vm183_vm1 = vcmask 64512  }
  0x4b   :  { %v1882_v5 = vpack.c.bf16 %v84_v4, %v83_v2  ;;  %v86_v7 = vld [vmem:[#allocation8 + $0x28] sm:$0xff]  ;;  %v79_v9 = vld [vmem:[#allocation3] sm:$0xff]  ;;  %v87_v10 = vld [vmem:[#allocation8 + $0x30] sm:$0xff]  ;;  %s2100_s25 = smov 88   ;;  %s2102_s26 = smov 80   ;;  %vm519_vm2 = vcmask 130112  }
  0x4c   :  { %1879 = vmatprep.subr.bf16.mxu0 %v1878_v3  ;;  %v1886_v8 = vpack.c.bf16 %v86_v7, %v85_v6  ;;  %v88_v11 = vld [vmem:[#allocation8 + $0x38] sm:$0xff]  ;;  %1784 = vmatprep.mubr.f32.mxu0 %v79_v9  ;;  %v89_v13 = vld [vmem:[#allocation8 + $0x40] sm:$0xff]  ;;  %v90_v14 = vld [vmem:[#allocation8 + $0x48] sm:$0xff]  ;;  %s2103_s27 = smov 120   ;;  %s2104_s28 = smov 112   ;;  %vm692_vm3 = vcmask 195712  }
  0x4d   :  { %1881 = vmatpush3.bf16.msra.mxu0 %v1878_v3  ;;  %v1890_v12 = vpack.c.bf16 %v88_v11, %v87_v10  ;;  %v1894_v15 = vpack.c.bf16 %v90_v14, %v89_v13  ;;  %v91_v16 = vld [vmem:[#allocation8 + $0x50] sm:$0xff]  ;;  %v92_v17 = vld [vmem:[#allocation8 + $0x58] sm:$0xff]  ;;  %v93_v19 = vld [vmem:[#allocation8 + $0x60] sm:$0xff]  ;;  %s2105_s29 = smov 48   ;;  %s2106_s30 = smov 72   ;;  %vm865_vm4 = vcmask 261312  }
  0x4e   :  { %1883 = vmatprep.subr.bf16.mxu0 %v1882_v5  ;;  %v1898_v18 = vpack.c.bf16 %v92_v17, %v91_v16  ;;  %v94_v20 = vld [vmem:[#allocation8 + $0x68] sm:$0xff]  ;;  %v95_v22 = vld [vmem:[#allocation8 + $0x70] sm:$0xff]  ;;  %v96_v23 = vld [vmem:[#allocation8 + $0x78] sm:$0xff]  ;;  %s2107_s7 = smov 104   ;;  %s2108_s8 = smov 40   ;;  %vm1565_vm5 = vcmask 261120  }
  0x4f   :  { %v1902_v21 = vpack.c.bf16 %v94_v20, %v93_v19  ;;  %v1906_v24 = vpack.c.bf16 %v96_v23, %v95_v22  ;;  %v80_v25 = vld [vmem:[#allocation3 + $0x8] sm:$0xff]  ;;  %v1668_v27 = vld [vmem:[%s2413_s3] ss:$0 sm:$0xff]  ;;  %s2101_s3 = smov 56   ;;  %s2109_s11 = smov 16  }
  0x50   :  { %v2247_v35 = vld [vmem:[#allocation6] sm:$0xff]  ;;  %s2110_s0 = smov 24   ;;  %s2111_s13 = smov [#allocation11]  }
  0x51   :  { %1885 = vmatpush3.bf16.msra.mxu0 %v1882_v5  ;;  %s1654_s14 = sshll.u32 %s2111_s13, 4  ;;  %s1655_s14 = int_to_ptr.vmem [resolvable:$true] %s1654_s14 }
  0x52   :  { %1887 = vmatprep.subr.bf16.mxu0 %v1886_v8  ;;  %s2060_s15 = scalar_lea.vmem %s1655_s14, 256  ;;  %p2065_p5 = scmp.lt.s32.totalorder %s1655_s14, %s1655_s14 }
  0x53   :  { %p2061_p4 = scmp.ne.s32.totalorder %s1655_s14, %s2060_s15  ;;  %p2066_p6 = scmp.lt.s32.totalorder %s2060_s15, %s2060_s15 }
  0x55   :  { %1889 = vmatpush3.bf16.msra.mxu0 %v1886_v8  ;;  %p2067_p7 = por %p2066_p6, %p2065_p5 }
  0x56   :  { %1891 = vmatprep.subr.bf16.mxu0 %v1890_v12 }
  0x57   :  { %p2068_p8 = pnand %p2067_p7, %p2061_p4 }
  0x59   :  { %1893 = vmatpush3.bf16.msra.mxu0 %v1890_v12 }
  0x5a   :  { %1895 = vmatprep.subr.bf16.mxu0 %v1894_v15 }
  0x5d   :  { %1897 = vmatpush3.bf16.msra.mxu0 %v1894_v15 }
  0x5e   :  { %1899 = vmatprep.subr.bf16.mxu0 %v1898_v18 }
  0x61   :  { %1901 = vmatpush3.bf16.msra.mxu0 %v1898_v18 }
  0x62   :  { %1903 = vmatprep.subr.bf16.mxu0 %v1902_v21 }
  0x65   :  { %1905 = vmatpush3.bf16.msra.mxu0 %v1902_v21 }
  0x66   :  { %1907 = vmatprep.subr.bf16.mxu0 %v1906_v24 }
  0x69   :  { %1909 = vmatpush3.bf16.msra.mxu0 %v1906_v24 }
  0x6a   :  { %1837 = vmatprep.subr.mxu0 %v2096_v26 }
  0x6c   :  { %1785 = vmatmul.mubr.f32.vlgmr.msra.gmra.mrb[0].mxu0 %v80_v25 }
  0x6d   :  { %1839 = vmatprep.mubr.msk.f32.mxu0 %vm2097_vm0, %v2096_v26 }
 0x13f   :  { %v1786_v28 = vpop.f32.mrb[0].mxu0 }
 0x140   :  { %v2230_v29 = vadd.f32 %v1786_v28, %v1668_v27  ;;  %v170_v30 = vpop.f32.mrb[1].mxu0 }
 0x141   :  { %v2232_v31 = vadd.f32 %v1668_v27, %v170_v30 }
 0x143   :  { %271 = vrot.lane.b32.xlu1 %v2232_v31, %s2098_s22  ;;  %181 = vrot.lane.b32.xlu0 %v2232_v31, %s2099_s23 }
 0x147   :  { %350 = vrot.lane.b32.xlu1 %v2232_v31, %s2100_s25 }
 0x1b5   :  { %v182_v32 = vpop.permute.xlu0 %181  ;;  %v272_v33 = vpop.permute.xlu1 %271 }
 0x1b6   :  { %1788 = vmatpush3.xpose.msk.msra.mxu1 %vm183_vm1, %v182_v32 }
 0x1b7   :  { %1792 = vmatprep.subr.mxu1 %v2096_v26 }
 0x1b9   :  { %1790 = vmatmul.mubr.msk.f32.vlgmr.msra.gmra.mrb[0].mxu1 %vm183_vm1, %v2232_v31  ;;  %v351_v45 = vpop.permute.xlu1 %350 }
 0x1ba   :  { %1793 = vmatpush3.msra.mxu1 %v272_v33  ;;  %1794 = vmatprep.mubr.msk.f32.mxu1 %vm2097_vm0, %v2096_v26 }
 0x1bb   :  { %1797 = vmatprep.subr.mxu1 %v2096_v26 }
 0x28c   :  { %v254_v34 = vpop.f32.mrb[0].mxu1 }
 0x28d   :  { %v258_v36 = vmul.f32 0.35355338, %v254_v34  ;;  %v1791_v37 = vpop.f32.mrb[1].mxu1 }
 0x28f   :  { %v259_v38 = vadd.f32 %v258_v36, %v2247_v35 }
 0x291   :  { %v260_v39 = vsel %vm183_vm1, %v259_v38, -inf }
 0x292   :  { %261 = vmax.xlane.f32.xlu0 %v260_v39 }
 0x2a8   :  { %439 = vrot.lane.b32.xlu0 %v2232_v31, %s2101_s3 }
 0x2ac   :  { %523 = vrot.lane.b32.xlu0 %v2232_v31, %s2102_s26 }
 0x31f   :  { %v262_v40 = vpop.xlane.xlu0 %261 }
 0x320   :  { %v263_v41 = vsub.f32 %v259_v38, %v262_v40 }
 0x322   :  { %v264_v42 = vmul.f32 1.442695, %v263_v41 }
 0x323   :  { %v440_v50 = vpop.permute.xlu0 %439 }
 0x324   :  { %1940 = vpow2.f32 %v264_v42 }
 0x327   :  { %v524_v63 = vpop.permute.xlu0 %523 }
 0x32e   :  { %v1941_v43 = vpop.eup %1940 }
 0x32f   :  { %v266_v44 = vsel %vm183_vm1, %v1941_v43, 0.0 }
 0x330   :  { %267 = vadd.xlane.f32.xlu1 %v266_v44 }
 0x341   :  { %348 = vrot.lane.b32.xlu1 %v2232_v31, %s2103_s27 }
 0x3bd   :  { %v268_v46 = vpop.xlane.xlu1 %267 }
 0x3be   :  { %1942 = vrcp.f32 %v268_v46 }
 0x3c1   :  { %v349_v49 = vpop.permute.xlu1 %348 }
 0x3c8   :  { %v1943_v47 = vpop.eup %1942 }
 0x3c9   :  { %v270_v48 = vmul.f32 %v1943_v47, %v1941_v43 }
 0x3cb   :  { %1795 = vmatmul.mubr.msk.f32.vlgmr.msra.gmra.mrb[2].mxu1 %vm183_vm1, %v270_v48  ;;  %v868_v48 = vld [vmem:[#allocation6 + $0x8] sm:$0xff] }
 0x3cc   :  { %1798 = vmatpush3.xpose.msk.msra.mxu1 %vm183_vm1, %v351_v45  ;;  %1799 = vmatprep.mubr.msk.f32.mxu1 %vm2097_vm0, %v2096_v26 }
 0x3cd   :  { %1802 = vmatprep.subr.mxu1 %v2096_v26 }
 0x3cf   :  { %1800 = vmatmul.mubr.msk.f32.vlgmr.msra.gmra.mrb[4].mxu1 %vm183_vm1, %v349_v49 }
 0x3d0   :  { %1803 = vmatpush3.msra.mxu1 %v440_v50  ;;  %1804 = vmatprep.mubr.msk.f32.mxu1 %vm2097_vm0, %v2096_v26 }
 0x3d1   :  { %1807 = vmatprep.subr.mxu1 %v2096_v26 }
 0x49e   :  { %v343_v51 = vpop.f32.mrb[2].mxu1 }
 0x49f   :  { %347 = vst.msk [vmem:[#allocation2] sm:$0xff] %vm183_vm1, %v343_v51  ;;  %v1796_v52 = vpop.f32.mrb[3].mxu1 }
 0x4a2   :  { %v422_v53 = vpop.f32.mrb[4].mxu1 }
 0x4a3   :  { %v426_v54 = vmul.f32 0.35355338, %v422_v53  ;;  %v1801_v55 = vpop.f32.mrb[5].mxu1 }
 0x4a5   :  { %v427_v56 = vadd.f32 %v426_v54, %v2247_v35 }
 0x4a7   :  { %v428_v57 = vsel %vm183_vm1, %v427_v56, -inf }
 0x4a8   :  { %429 = vmax.xlane.f32.xlu1 %v428_v57 }
 0x535   :  { %v430_v58 = vpop.xlane.xlu1 %429 }
 0x536   :  { %v431_v59 = vsub.f32 %v427_v56, %v430_v58 }
 0x538   :  { %v432_v60 = vmul.f32 1.442695, %v431_v59 }
 0x53a   :  { %1944 = vpow2.f32 %v432_v60 }
 0x544   :  { %v1945_v61 = vpop.eup %1944 }
 0x545   :  { %v434_v62 = vsel %vm183_vm1, %v1945_v61, 0.0 }
 0x546   :  { %435 = vadd.xlane.f32.xlu0 %v434_v62 }
 0x55c   :  { %521 = vrot.lane.b32.xlu0 %v2232_v31, %s2104_s28 }
 0x5d3   :  { %v436_v0 = vpop.xlane.xlu0 %435 }
 0x5d4   :  { %1946 = vrcp.f32 %v436_v0 }
 0x5d7   :  { %v522_v3 = vpop.permute.xlu0 %521 }
 0x5de   :  { %v1947_v1 = vpop.eup %1946 }
 0x5df   :  { %v438_v2 = vmul.f32 %v1947_v1, %v1945_v61 }
 0x5e1   :  { %1805 = vmatmul.mubr.msk.f32.vlgmr.msra.gmra.mrb[6].mxu1 %vm183_vm1, %v438_v2 }
 0x5e2   :  { %1808 = vmatpush3.xpose.msk.msra.mxu1 %vm183_vm1, %v524_v63  ;;  %1809 = vmatprep.mubr.msk.f32.mxu1 %vm2097_vm0, %v2096_v26 }
 0x5e3   :  { %1812 = vmatprep.subr.mxu1 %v2096_v26 }
 0x5e5   :  { %1810 = vmatmul.mubr.msk.f32.vlgmr.msra.gmra.mrb[8].mxu1 %vm183_vm1, %v522_v3 }
 0x5e6   :  { %1814 = vmatprep.mubr.msk.f32.mxu1 %vm2097_vm0, %v2096_v26 }
 0x6b4   :  { %v2281_v4 = vpop.f32.mrb[6].mxu1 }
 0x6b5   :  { %v1806_v5 = vpop.f32.mrb[7].mxu1 }
 0x6b8   :  { %v595_v6 = vpop.f32.mrb[8].mxu1 }
 0x6b9   :  { %v599_v7 = vmul.f32 0.35355338, %v595_v6  ;;  %v1811_v8 = vpop.f32.mrb[9].mxu1 }
 0x6bb   :  { %v600_v9 = vadd.f32 %v599_v7, %v2247_v35 }
 0x6bd   :  { %v601_v10 = vsel %vm183_vm1, %v600_v9, -inf }
 0x6be   :  { %602 = vmax.xlane.f32.xlu1 %v601_v10 }
 0x6cf   :  { %612 = vrot.lane.b32.xlu1 %v2232_v31, %s2105_s29 }
 0x6d3   :  { %696 = vrot.lane.b32.xlu1 %v2232_v31, %s2106_s30 }
 0x6d7   :  { %694 = vrot.lane.b32.xlu1 %v2232_v31, %s2107_s7 }
 0x74b   :  { %v603_v11 = vpop.xlane.xlu1 %602 }
 0x74c   :  { %v604_v12 = vsub.f32 %v600_v9, %v603_v11 }
 0x74e   :  { %v605_v13 = vmul.f32 1.442695, %v604_v12 }
 0x74f   :  { %v613_v14 = vpop.permute.xlu1 %612 }
 0x750   :  { %1948 = vpow2.f32 %v605_v13  ;;  %1813 = vmatpush3.msra.mxu1 %v613_v14 }
 0x751   :  { %1817 = vmatprep.subr.mxu1 %v2096_v26 }
 0x753   :  { %v697_v21 = vpop.permute.xlu1 %696 }
 0x757   :  { %v695_v24 = vpop.permute.xlu1 %694 }
 0x75a   :  { %v1949_v15 = vpop.eup %1948 }
 0x75b   :  { %v607_v16 = vsel %vm183_vm1, %v1949_v15, 0.0 }
 0x75c   :  { %608 = vadd.xlane.f32.xlu0 %v607_v16 }
 0x772   :  { %785 = vrot.lane.b32.xlu0 %v2232_v31, %s2108_s8 }
 0x776   :  { %870 = vrot.lane.b32.xlu0 %v2230_v29, %s2099_s23 }
 0x77a   :  { %1038 = vrot.lane.b32.xlu0 %v2230_v29, %s2100_s25 }
 0x7e9   :  { %v609_v17 = vpop.xlane.xlu0 %608 }
 0x7ea   :  { %1950 = vrcp.f32 %v609_v17 }
 0x7ed   :  { %v786_v18 = vpop.permute.xlu0 %785 }
 0x7f1   :  { %v871_v19 = vpop.permute.xlu0 %870 }
 0x7f4   :  { %v1951_v20 = vpop.eup %1950 }
 0x7f5   :  { %v611_v22 = vmul.f32 %v1951_v20, %v1949_v15  ;;  %v1039_v23 = vpop.permute.xlu0 %1038 }
 0x7f6   :  { %1838 = vmatpush3.xpose.msk.msra.mxu0 %vm183_vm1, %v1039_v23 }
 0x7f7   :  { %1815 = vmatmul.mubr.msk.f32.vlgmr.msra.gmra.mrb[10].mxu1 %vm183_vm1, %v611_v22  ;;  %1847 = vmatprep.subr.mxu0 %v2096_v26 }
 0x7f8   :  { %1818 = vmatpush3.xpose.msk.msra.mxu1 %vm183_vm1, %v697_v21  ;;  %1819 = vmatprep.mubr.msk.f32.mxu1 %vm2097_vm0, %v2096_v26 }
 0x7f9   :  { %1822 = vmatprep.subr.mxu1 %v2096_v26 }
 0x7fb   :  { %1820 = vmatmul.mubr.msk.f32.vlgmr.msra.gmra.mrb[12].mxu1 %vm183_vm1, %v695_v24 }
 0x7fc   :  { %1823 = vmatpush3.msra.mxu1 %v786_v18  ;;  %1824 = vmatprep.mubr.msk.f32.mxu1 %vm2097_vm0, %v2096_v26 }
 0x7fd   :  { %1827 = vmatprep.subr.mxu1 %v2096_v26 }
 0x8ca   :  { %v2310_v25 = vpop.f32.mrb[10].mxu1 }
 0x8cb   :  { %v1816_v27 = vpop.f32.mrb[11].mxu1 }
 0x8ce   :  { %v768_v28 = vpop.f32.mrb[12].mxu1 }
 0x8cf   :  { %v772_v30 = vmul.f32 0.35355338, %v768_v28  ;;  %v1821_v31 = vpop.f32.mrb[13].mxu1 }
 0x8d1   :  { %v773_v32 = vadd.f32 %v772_v30, %v2247_v35 }
 0x8d3   :  { %v774_v33 = vsel %vm183_vm1, %v773_v32, -inf }
 0x8d4   :  { %775 = vmax.xlane.f32.xlu1 %v774_v33 }
 0x8e5   :  { %1036 = vrot.lane.b32.xlu1 %v2230_v29, %s2103_s27 }
 0x961   :  { %v776_v34 = vpop.xlane.xlu1 %775 }
 0x962   :  { %v777_v36 = vsub.f32 %v773_v32, %v776_v34 }
 0x964   :  { %v778_v37 = vmul.f32 1.442695, %v777_v36 }
 0x965   :  { %v1037_v38 = vpop.permute.xlu1 %1036 }
 0x966   :  { %1952 = vpow2.f32 %v778_v37  ;;  %1840 = vmatmul.mubr.msk.f32.vlgmr.msra.gmra.mrb[2].mxu0 %vm183_vm1, %v1037_v38 }
 0x967   :  { %1849 = vmatprep.mubr.msk.f32.mxu0 %vm2097_vm0, %v2096_v26 }
 0x970   :  { %v1953_v39 = vpop.eup %1952 }
 0x971   :  { %v780_v40 = vsel %vm183_vm1, %v1953_v39, 0.0 }
 0x972   :  { %781 = vadd.xlane.f32.xlu0 %v780_v40 }
 0x988   :  { %1210 = vrot.lane.b32.xlu0 %v2230_v29, %s2102_s26 }
 0x98c   :  { %1208 = vrot.lane.b32.xlu0 %v2230_v29, %s2104_s28 }
 0x990   :  { %1382 = vrot.lane.b32.xlu0 %v2230_v29, %s2106_s30 }
 0x994   :  { %1380 = vrot.lane.b32.xlu0 %v2230_v29, %s2107_s7 }
 0x9ff   :  { %v782_v35 = vpop.xlane.xlu0 %781 }
 0xa00   :  { %1954 = vrcp.f32 %v782_v35 }
 0xa03   :  { %v1211_v41 = vpop.permute.xlu0 %1210 }
 0xa04   :  { %1848 = vmatpush3.xpose.msk.msra.mxu0 %vm183_vm1, %v1211_v41 }
 0xa05   :  { %1857 = vmatprep.subr.mxu0 %v2096_v26 }
 0xa07   :  { %v1209_v42 = vpop.permute.xlu0 %1208 }
 0xa08   :  { %1850 = vmatmul.mubr.msk.f32.vlgmr.msra.gmra.mrb[4].mxu0 %vm183_vm1, %v1209_v42 }
 0xa09   :  { %1859 = vmatprep.mubr.msk.f32.mxu0 %vm2097_vm0, %v2096_v26 }
 0xa0a   :  { %v1955_v43 = vpop.eup %1954 }
 0xa0b   :  { %v784_v44 = vmul.f32 %v1955_v43, %v1953_v39  ;;  %v1383_v45 = vpop.permute.xlu0 %1382 }
 0xa0c   :  { %1858 = vmatpush3.xpose.msk.msra.mxu0 %vm183_vm1, %v1383_v45 }
 0xa0d   :  { %1825 = vmatmul.mubr.msk.f32.vlgmr.msra.gmra.mrb[14].mxu1 %vm183_vm1, %v784_v44 }
 0xa0e   :  { %1828 = vmatpush3.xpose.msk.msra.mxu1 %vm183_vm1, %v871_v19  ;;  %1829 = vmatprep.mubr.msk.f32.mxu1 %vm2097_vm0, %v2096_v26 }
 0xa0f   :  { %v1381_v46 = vpop.permute.xlu0 %1380  ;;  %1832 = vmatprep.subr.mxu1 %v2096_v26 }
 0xa10   :  { %1860 = vmatmul.mubr.msk.f32.vlgmr.msra.gmra.mrb[6].mxu0 %vm183_vm1, %v1381_v46 }
 0xa11   :  { %1830 = vmatmul.mubr.msk.f32.vlgmr.msra.gmra.mrb[16].mxu1 %vm183_vm1, %v2230_v29 }
 0xa12   :  { %1834 = vmatprep.mubr.msk.f32.mxu1 %vm2097_vm0, %v2096_v26 }
 0xa39   :  { %v1110_v47 = vpop.f32.mrb[2].mxu0 }
 0xa3a   :  { %v1114_v49 = vmul.f32 0.35355338, %v1110_v47  ;;  %v1841_v50 = vpop.f32.mrb[3].mxu0  ;;  %v1554_v47 = vld [vmem:[#allocation9] sm:$0xff] }
 0xa3c   :  { %v1115_v51 = vadd.f32 %v1114_v49, %v868_v48 }
 0xa3e   :  { %v1116_v52 = vsel %vm183_vm1, %v1115_v51, -inf }
 0xa3f   :  { %1117 = vmax.xlane.f32.xlu0 %v1116_v52  ;;  %v1557_v52 = vld [vmem:[#allocation9 + $0x18] sm:$0xff] }
 0xacc   :  { %v1118_v53 = vpop.xlane.xlu0 %1117 }
 0xacd   :  { %v1119_v55 = vsub.f32 %v1115_v51, %v1118_v53  ;;  %v1556_v51 = vld [vmem:[#allocation9 + $0x10] sm:$0xff] }
 0xacf   :  { %v1120_v59 = vmul.f32 1.442695, %v1119_v55 }
 0xad1   :  { %1956 = vpow2.f32 %v1120_v59 }
 0xadb   :  { %v1282_v54 = vpop.f32.mrb[4].mxu0  ;;  %v1957_v10 = vpop.eup %1956 }
 0xadc   :  { %v1286_v56 = vmul.f32 0.35355338, %v1282_v54  ;;  %v1851_v57 = vpop.f32.mrb[5].mxu0  ;;  %v1122_v11 = vsel %vm183_vm1, %v1957_v10, 0.0  ;;  %v1914_v54 = vpack.c.bf16 %v1557_v52, %v1556_v51 }
 0xade   :  { %v1287_v58 = vadd.f32 %v1286_v56, %v868_v48 }
 0xae0   :  { %v857_v60 = vpop.f32.mrb[14].mxu1  ;;  %v1288_v61 = vsel %vm183_vm1, %v1287_v58, -inf }
 0xae1   :  { %1289 = vmax.xlane.f32.xlu0 %v1288_v61  ;;  %v1826_v62 = vpop.f32.mrb[15].mxu1 }
 0xae3   :  { %v1454_v63 = vpop.f32.mrb[6].mxu0 }
 0xae4   :  { %v942_v0 = vpop.f32.mrb[16].mxu1  ;;  %v1861_v1 = vpop.f32.mrb[7].mxu0  ;;  %v1458_v2 = vmul.f32 0.35355338, %v1454_v63 }
 0xae5   :  { %v946_v3 = vmul.f32 0.35355338, %v942_v0  ;;  %v1831_v5 = vpop.f32.mrb[17].mxu1  ;;  %v1693_v0 = vld [vmem:[%s2415_s5] ss:$0 sm:$0xff] }
 0xae6   :  { %v1459_v8 = vadd.f32 %v1458_v2, %v868_v48 }
 0xae7   :  { %v947_v6 = vadd.f32 %v946_v3, %v868_v48  ;;  %v1555_v48 = vld [vmem:[#allocation9 + $0x8] sm:$0xff] }
 0xae8   :  { %v1460_v9 = vsel %vm183_vm1, %v1459_v8, -inf  ;;  %v1910_v49 = vpack.c.bf16 %v1555_v48, %v1554_v47 }
 0xae9   :  { %v948_v7 = vsel %vm183_vm1, %v947_v6, -inf }
 0xaea   :  { %949 = vmax.xlane.f32.xlu1 %v948_v7  ;;  %1911 = vmatprep.subr.bf16.mxu0 %v1910_v49 }
 0xaeb   :  { %1913 = vmatpush3.bf16.msra.mxu0 %v1910_v49 }
 0xaec   :  { %1915 = vmatprep.subr.bf16.mxu0 %v1914_v54 }
 0xaee   :  { %1461 = vmax.xlane.f32.xlu1 %v1460_v9 }
 0xaef   :  { %1917 = vmatpush3.bf16.msra.mxu0 %v1914_v54 }
 0xaf2   :  { %1123 = vadd.xlane.f32.xlu1 %v1122_v11 }
 0xb6e   :  { %v1290_v12 = vpop.xlane.xlu0 %1289 }
 0xb6f   :  { %v1291_v13 = vsub.f32 %v1287_v58, %v1290_v12 }
 0xb71   :  { %v1292_v14 = vmul.f32 1.442695, %v1291_v13 }
 0xb73   :  { %1958 = vpow2.f32 %v1292_v14 }
 0xb77   :  { %v950_v15 = vpop.xlane.xlu1 %949 }
 0xb78   :  { %v951_v16 = vsub.f32 %v947_v6, %v950_v15 }
 0xb7a   :  { %v952_v17 = vmul.f32 1.442695, %v951_v16 }
 0xb7b   :  { %v1462_v18 = vpop.xlane.xlu1 %1461 }
 0xb7c   :  { %1960 = vpow2.f32 %v952_v17  ;;  %v1463_v19 = vsub.f32 %v1459_v8, %v1462_v18 }
 0xb7d   :  { %v1959_v20 = vpop.eup %1958 }
 0xb7e   :  { %v1464_v21 = vmul.f32 1.442695, %v1463_v19  ;;  %v1294_v22 = vsel %vm183_vm1, %v1959_v20, 0.0 }
 0xb7f   :  { %1295 = vadd.xlane.f32.xlu0 %v1294_v22  ;;  %v1124_v31 = vpop.xlane.xlu1 %1123 }
 0xb80   :  { %1962 = vpow2.f32 %v1464_v21 }
 0xb86   :  { %v1961_v23 = vpop.eup %1960 }
 0xb87   :  { %v954_v24 = vsel %vm183_vm1, %v1961_v23, 0.0 }
 0xb88   :  { %955 = vadd.xlane.f32.xlu0 %v954_v24 }
 0xb8a   :  { %v1963_v27 = vpop.eup %1962 }
 0xb8b   :  { %v1466_v28 = vsel %vm183_vm1, %v1963_v27, 0.0 }
 0xb8c   :  { %1467 = vadd.xlane.f32.xlu1 %v1466_v28 }
 0xb9d   :  { %1127 = vrot.lane.b32.xlu1 %v2230_v29, %s2101_s3 }
 0xb9e   :  { %959 = vrot.lane.b32.xlu0 %v2230_v29, %s2098_s22 }
 0xba1   :  { %1299 = vrot.lane.b32.xlu1 %v2230_v29, %s2105_s29 }
 0xba2   :  { %1471 = vrot.lane.b32.xlu0 %v2230_v29, %s2108_s8 }
 0xba5   :  { %516 = vrot.lane.b32.xlu1 %v2281_v4, %s2093_s10 }
 0xba6   :  { %689 = vrot.lane.b32.xlu0 %v2310_v25, %s2109_s11 }
 0xbaa   :  { %862 = vrot.lane.b32.xlu0 %v857_v60, %s2110_s0 }
 0xc0c   :  { %v1296_v30 = vpop.xlane.xlu0 %1295 }
 0xc15   :  { %v956_v32 = vpop.xlane.xlu0 %955 }
 0xc16   :  { %1964 = vrcp.f32 %v956_v32 }
 0xc17   :  { %1966 = vrcp.f32 %v1124_v31 }
 0xc18   :  { %1968 = vrcp.f32 %v1296_v30 }
 0xc19   :  { %v960_v33 = vpop.permute.xlu0 %959  ;;  %v1468_v34 = vpop.xlane.xlu1 %1467 }
 0xc1a   :  { %1833 = vmatpush3.msra.mxu1 %v960_v33  ;;  %1970 = vrcp.f32 %v1468_v34 }
 0xc1b   :  { %1842 = vmatprep.subr.mxu1 %v2096_v26 }
 0xc1d   :  { %v1472_v29 = vpop.permute.xlu0 %1471  ;;  %v1128_v4 = vpop.permute.xlu1 %1127 }
 0xc20   :  { %v1965_v36 = vpop.eup %1964 }
 0xc21   :  { %v958_v37 = vmul.f32 %v1965_v36, %v1961_v23  ;;  %v690_v25 = vpop.permute.xlu0 %689  ;;  %v1300_v38 = vpop.permute.xlu1 %1299 }
 0xc22   :  { %v1967_v39 = vpop.eup %1966 }
 0xc23   :  { %1835 = vmatmul.mubr.msk.f32.vlgmr.msra.gmra.mrb[18].mxu1 %vm183_vm1, %v958_v37  ;;  %v1126_v40 = vmul.f32 %v1967_v39, %v1957_v10  ;;  %v1969_v41 = vpop.eup %1968 }
 0xc24   :  { %1843 = vmatpush3.msra.mxu1 %v1128_v4  ;;  %1844 = vmatprep.mubr.msk.f32.mxu1 %vm2097_vm0, %v2096_v26  ;;  %v1298_v43 = vmul.f32 %v1969_v41, %v1959_v20  ;;  %v1971_v44 = vpop.eup %1970 }
 0xc25   :  { %v517_v35 = vpop.permute.xlu1 %516  ;;  %1852 = vmatprep.subr.mxu1 %v2096_v26  ;;  %v863_v42 = vpop.permute.xlu0 %862  ;;  %v1470_v45 = vmul.f32 %v1971_v44, %v1963_v27 }
 0xc26   :  { %520 = vst.msk [vmem:[#allocation2] sm:$0xff] %vm519_vm2, %v517_v35 }
 0xc27   :  { %693 = vst.msk [vmem:[#allocation2] sm:$0xff] %vm692_vm3, %v690_v25  ;;  %1845 = vmatmul.mubr.msk.f32.vlgmr.msra.gmra.mrb[20].mxu1 %vm183_vm1, %v1126_v40 }
 0xc28   :  { %866 = vst.msk [vmem:[#allocation2] sm:$0xff] %vm865_vm4, %v863_v42  ;;  %1853 = vmatpush3.msra.mxu1 %v1300_v38  ;;  %1854 = vmatprep.mubr.msk.f32.mxu1 %vm2097_vm0, %v2096_v26 }
 0xc29   :  { %1862 = vmatprep.subr.mxu1 %v2096_v26 }
 0xc2b   :  { %1855 = vmatmul.mubr.msk.f32.vlgmr.msra.gmra.mrb[22].mxu1 %vm183_vm1, %v1298_v43 }
 0xc2c   :  { %1863 = vmatpush3.msra.mxu1 %v1472_v29  ;;  %1864 = vmatprep.mubr.msk.f32.mxu1 %vm2097_vm0, %v2096_v26 }
 0xc2f   :  { %1865 = vmatmul.mubr.msk.f32.vlgmr.msra.gmra.mrb[24].mxu1 %vm183_vm1, %v1470_v45  ;;  %v1552_v46 = vld [vmem:[#allocation2] sm:$0xff] }
 0xc30   :  { %1875 = vmatprep.mubr.msk.f32.mxu0 %vm1565_vm5, %v1552_v46 }
 0xcf6   :  { %v1031_v50 = vpop.f32.mrb[18].mxu1 }
 0xcf7   :  { %1035 = vst.msk [vmem:[#allocation2 + $0x8] sm:$0xff] %vm183_vm1, %v1031_v50  ;;  %v1836_v53 = vpop.f32.mrb[19].mxu1 }
 0xcfa   :  { %v1199_v26 = vpop.f32.mrb[20].mxu1 }
 0xcfb   :  { %1204 = vrot.lane.b32.xlu1 %v1199_v26, %s2093_s10  ;;  %v1846_v55 = vpop.f32.mrb[21].mxu1 }
 0xcfe   :  { %v1371_v56 = vpop.f32.mrb[22].mxu1 }
 0xcff   :  { %1376 = vrot.lane.b32.xlu1 %v1371_v56, %s2109_s11  ;;  %v1856_v57 = vpop.f32.mrb[23].mxu1 }
 0xd02   :  { %v1543_v58 = vpop.f32.mrb[24].mxu1 }
 0xd03   :  { %1548 = vrot.lane.b32.xlu0 %v1543_v58, %s2110_s0  ;;  %v1866_v59 = vpop.f32.mrb[25].mxu1 }
 0xd6d   :  { %v1205_v60 = vpop.permute.xlu1 %1204 }
 0xd6e   :  { %1207 = vst.msk [vmem:[#allocation2 + $0x8] sm:$0xff] %vm519_vm2, %v1205_v60 }
 0xd71   :  { %v1377_v61 = vpop.permute.xlu1 %1376 }
 0xd72   :  { %1379 = vst.msk [vmem:[#allocation2 + $0x8] sm:$0xff] %vm692_vm3, %v1377_v61 }
 0xd75   :  { %v1549_v62 = vpop.permute.xlu0 %1548 }
 0xd76   :  { %1551 = vst.msk [vmem:[#allocation2 + $0x8] sm:$0xff] %vm865_vm4, %v1549_v62 }
 0xd7d   :  { %v1553_v63 = vld [vmem:[#allocation2 + $0x8] sm:$0xff] }
 0xd7e   :  { %1876 = vmatmul.mubr.msk.f32.vlgmr.msra.gmra.mrb[8].mxu0 %vm1565_vm5, %v1553_v63 }
 0xe51   :  { %v1877_v1 = vpop.f32.mrb[8].mxu0 }
 0xe52   :  { %v1644_v2 = vadd.f32 %v1877_v1, %v1693_v0  ;;  %v1638_v3 = vpop.f32.mrb[9].mxu0 }
 0xe53   :  { %v1639_v5 = vadd.f32 %v1693_v0, %v1638_v3 }
 0xe54   :  { %1648 = vst.msk [vmem:[#allocation11 + $0x8] sm:$0xff] %vm1565_vm5, %v1644_v2 }
 0xe55   :  { %1647 = vst.msk [vmem:[#allocation11] sm:$0xff] %vm1565_vm5, %v1639_v5 }
 0xe56   :  { %2071 = shalt.err (!%p2068_p8)
}
 0xe57   :  { %s2072_s17 = scalar_lea.hbm %s2416_s6, 256 }
 0xe58   :  { %p2073_p9 = scmp.ne.s32.totalorder %s2416_s6, %s2072_s17  ;;  %p2076_p10 = scmp.lt.u32.totalorder %s2072_s17, %s2416_s6 }
 0xe5a   :  { %p2078_p11 = pnand %p2076_p10, %p2073_p9 }
 0xe5c   :  { %2081 = shalt.err (!%p2078_p11)
}
 0xe5d   :  { %1660 = dma.vmem_to_hbm [thread:$0]  %s1655_s14, 256, %s2416_s6, [#allocation5], %s2092_s9, %s2092_s9, %s2093_s10  }
 0xe5e   :  { %2088 = dma.done.wait [#allocation5], 256  }
 0xe5f   :  { %2089 = vsyncadd [#allocation5], 4294967040 }
 0xe60   :  { %1664 = vsyncpa [#allocation4], 1 }
 0xe61   :  { %1665 = vsyncpa [#allocation7], 1 }
 0xe62   :  { %1666 = vsyncpa [#allocation10], 1 }
 0xe63   :  { %1667 = vsyncpa [#allocation5], 1 }

</bundles_post_ra>
